<compile_context>
chip_gen: v5e
topology: v5e:2x2
jax: 0.10.0
libtpu: 0.0.40
codegen_flags: <defaults>
</compile_context>

<pallas_src>
import functools

import jax
import jax.numpy as jnp
from jax import lax
from jax.experimental import pallas as pl
from jax.experimental.pallas import tpu as pltpu


def _round_up(x, m):
    return ((x + m - 1) // m) * m


# --------------------------------------------------------------------------- kernel
def _graph_accumulate(gid_row, nodewise_f32, graph_ref, *, use_tanh):
    """index_add_: accumulate nodewise rows into the resident (G, C) accumulator.

    gid_row      : (1, TILE_N) int32 graph ids (-1 on padded rows -> no contribution)
    nodewise_f32 : (TILE_N, C) f32
    graph_ref    : (G, C) f32 output block, same block index every grid step
    """
    step = pl.program_id(0)

    @pl.when(step == 0)
    def _():
        graph_ref[...] = jnp.zeros_like(graph_ref)

    g = graph_ref.shape[0]
    tile_n = nodewise_f32.shape[0]
    # One-hot built pre-transposed (G, TILE_N): standard MXU matmul, no XLU transpose.
    graph_iota = lax.broadcasted_iota(jnp.int32, (g, tile_n), 0)
    onehot_t = (graph_iota == gid_row).astype(jnp.float32)            # (G, TILE_N)
    graph_ref[...] += jnp.dot(onehot_t, nodewise_f32,
                              preferred_element_type=jnp.float32)     # (G, C)

    @pl.when(step == pl.num_programs(0) - 1)
    def _():
        if use_tanh:
            graph_ref[...] = jnp.tanh(graph_ref[...])


def _readout_kernel(*refs, use_tanh, has_graph, combined):
    """Fused nodewise readout + graph index_add_.

    Ref order (inputs then outputs):
      [gid_row?] x_in x_out  (combined: wg_in, w_out_comb, b_comb
                              else:     wg_in, wg_out, wt, bg, bt)
      node_out [graph_out?]
    """
    it = iter(refs)
    gid_ref = next(it) if has_graph else None
    x_in_ref = next(it)
    x_out_ref = next(it)
    if combined:
        wg_in_ref = next(it)     # (H, Cp)
        w_out_ref = next(it)     # (H, 2*Cp) = [Wg_out^T | Wt^T]
        b_ref = next(it)         # (1, 2*Cp) = [bg | bt]
    else:
        wg_in_ref = next(it)     # (H, C)
        wg_out_ref = next(it)    # (H, C)
        wt_ref = next(it)        # (H, C)
        bg_ref = next(it)        # (1, C)
        bt_ref = next(it)        # (1, C)
    node_ref = next(it)
    graph_ref = next(it) if has_graph else None

    # Upcast streamed activations (bf16 streaming keeps f32 accumulation).
    x_in = x_in_ref[...].astype(jnp.float32)
    x_out = x_out_ref[...].astype(jnp.float32)

    if combined:
        cp = w_out_ref.shape[1] // 2
        comb = jnp.dot(x_out, w_out_ref[...], preferred_element_type=jnp.float32)
        comb = comb + b_ref[...]
        gate = jnp.dot(x_in, wg_in_ref[...], preferred_element_type=jnp.float32)
        gate = gate + comb[:, :cp]            # 128-aligned lane split
        trans = comb[:, cp:]
    else:
        gate = jnp.dot(x_in, wg_in_ref[...], preferred_element_type=jnp.float32)
        gate = gate + jnp.dot(x_out, wg_out_ref[...],
                              preferred_element_type=jnp.float32)
        gate = gate + bg_ref[...]
        trans = jnp.dot(x_out, wt_ref[...],
                        preferred_element_type=jnp.float32) + bt_ref[...]

    if use_tanh:
        trans = jnp.tanh(trans)
    nodewise = jax.nn.sigmoid(gate) * trans
    node_ref[...] = nodewise.astype(node_ref.dtype)

    if has_graph:
        _graph_accumulate(gid_ref[...], nodewise, graph_ref, use_tanh=use_tanh)


# --------------------------------------------------------------------------- wrapper
def readout_forward(raw_node_in, raw_node_out, gate_w, gate_b, trans_w, trans_b,
                    graph_nodes_list=None, num_graphs=None,
                    use_tanh_readout=False, tile_n=1024,
                    activation_dtype=None, pad_lanes=None):
    """Pallas equivalent of Readout.forward (eval mode, readout_mask=None).

    gate_w : (C, 2H)  regression_gate weight   (PyTorch layout)
    trans_w: (C, H)   regression_transform weight
    activation_dtype: optional streaming dtype for the node activations (e.g. bf16).
    """
    n, h = raw_node_in.shape
    c = gate_w.shape[0]
    assert raw_node_out.shape == (n, h)
    assert gate_w.shape == (c, 2 * h) and trans_w.shape == (c, h)

    out_dtype = jnp.float32
    stream_dtype = (jnp.dtype(activation_dtype) if activation_dtype is not None
                    else jnp.dtype(jnp.float32))
    x_in = jnp.asarray(raw_node_in).astype(stream_dtype)
    x_out = jnp.asarray(raw_node_out).astype(stream_dtype)

    # Lane-pad C to 128 (and merge the x_out matmuls) when C is narrow but H is big
    # enough that the extra write traffic is negligible vs the 2*N*H input reads.
    if pad_lanes is None:
        pad_lanes = (c % 128 != 0) and (h >= 256)
    cp = _round_up(c, 128) if pad_lanes else c
    combined = pad_lanes  # combined x_out weight only when the split is 128-aligned

    # Row tiling: sublane-aligned; when more than one tile is needed use a multiple
    # of 128 so the (1, tile_n) gid block is lane-aligned too.
    row_align = 16 if stream_dtype == jnp.bfloat16 else 8
    n_up = _round_up(n, row_align)
    tile_n = max(row_align, int(tile_n))
    if tile_n >= n_up:
        tile_n = n_up
    else:
        tile_n = max(128, (tile_n // 128) * 128)
        tile_n = min(tile_n, _round_up(n_up, 128))
    nt = pl.cdiv(n, tile_n)
    n_pad = nt * tile_n

    if n_pad != n:
        pad = n_pad - n
        x_in = jnp.pad(x_in, ((0, pad), (0, 0)))
        x_out = jnp.pad(x_out, ((0, pad), (0, 0)))

    # Layout plumbing in the wrapper: split + transpose the gate weight, pad lanes.
    gate_w = jnp.asarray(gate_w, jnp.float32)
    trans_w = jnp.asarray(trans_w, jnp.float32)
    bg = jnp.asarray(gate_b, jnp.float32).reshape(1, c)
    bt = jnp.asarray(trans_b, jnp.float32).reshape(1, c)
    wg_in_t = gate_w[:, :h].T          # (H, C)
    wg_out_t = gate_w[:, h:].T         # (H, C)
    wt_t = trans_w.T                   # (H, C)
    if cp != c:
        pc = cp - c
        wg_in_t = jnp.pad(wg_in_t, ((0, 0), (0, pc)))
        wg_out_t = jnp.pad(wg_out_t, ((0, 0), (0, pc)))
        wt_t = jnp.pad(wt_t, ((0, 0), (0, pc)))
        bg = jnp.pad(bg, ((0, 0), (0, pc)))
        bt = jnp.pad(bt, ((0, 0), (0, pc)))

    has_graph = graph_nodes_list is not None

    inputs = []
    in_specs = []
    if has_graph:
        assert num_graphs is not None, "graph labels require num_graphs"
        gids = jnp.asarray(graph_nodes_list, jnp.int32).reshape(1, n)
        if n_pad != n:
            gids = jnp.pad(gids, ((0, 0), (0, n_pad - n)), constant_values=-1)
        inputs.append(gids)
        in_specs.append(pl.BlockSpec((1, tile_n), lambda i: (0, i)))

    inputs += [x_in, x_out]
    in_specs += [pl.BlockSpec((tile_n, h), lambda i: (i, 0)),
                 pl.BlockSpec((tile_n, h), lambda i: (i, 0))]

    if combined:
        w_out_comb = jnp.concatenate([wg_out_t, wt_t], axis=1)   # (H, 2*Cp)
        b_comb = jnp.concatenate([bg, bt], axis=1)                # (1, 2*Cp)
        inputs += [wg_in_t, w_out_comb, b_comb]
        in_specs += [pl.BlockSpec((h, cp), lambda i: (0, 0)),
                     pl.BlockSpec((h, 2 * cp), lambda i: (0, 0)),
                     pl.BlockSpec((1, 2 * cp), lambda i: (0, 0))]
    else:
        inputs += [wg_in_t, wg_out_t, wt_t, bg, bt]
        in_specs += [pl.BlockSpec((h, cp), lambda i: (0, 0)),
                     pl.BlockSpec((h, cp), lambda i: (0, 0)),
                     pl.BlockSpec((h, cp), lambda i: (0, 0)),
                     pl.BlockSpec((1, cp), lambda i: (0, 0)),
                     pl.BlockSpec((1, cp), lambda i: (0, 0))]

    node_shape = jax.ShapeDtypeStruct((n_pad, cp), out_dtype)
    node_spec = pl.BlockSpec((tile_n, cp), lambda i: (i, 0))

    kernel = functools.partial(_readout_kernel, use_tanh=use_tanh_readout,
                               has_graph=has_graph, combined=combined)

    if has_graph:
        out_shape = (node_shape,
                     jax.ShapeDtypeStruct((num_graphs, cp), jnp.float32))
        out_specs = (node_spec,
                     pl.BlockSpec((num_graphs, cp), lambda i: (0, 0)))
        semantics = ("arbitrary",)   # resident graph accumulator across node tiles
    else:
        out_shape = node_shape
        out_specs = node_spec
        semantics = ("parallel",)    # pure streaming pass; shard across TCs

    outs = pl.pallas_call(
        kernel,
        out_shape=out_shape,
        grid=(nt,),
        in_specs=in_specs,
        out_specs=out_specs,
        compiler_params=pltpu.CompilerParams(dimension_semantics=semantics),
    )(*inputs)

    if has_graph:
        node_pad, graph_pad = outs
        return node_pad[:n, :c], graph_pad[:, :c]
    return outs[:n, :c], None


# --------------------------------------------------------------------------- reference
def _reference(x_in, x_out, gate_w, gate_b, trans_w, trans_b,
               gids, num_graphs, use_tanh):
    gate_input = jnp.concatenate([x_in, x_out], axis=-1)
    gating = jax.nn.sigmoid(gate_input @ gate_w.T + gate_b)
    trans = x_out @ trans_w.T + trans_b
    if use_tanh:
        trans = jnp.tanh(trans)
    nodewise = gating * trans
    graph = None
    if gids is not None:
        onehot = jax.nn.one_hot(gids, num_graphs, dtype=jnp.float32)  # (N, G)
        graph = onehot.T @ nodewise
        if use_tanh:
            graph = jnp.tanh(graph)
    return nodewise, graph


def _xavier_uniform(key, shape, gain=1.0):
    fan_out, fan_in = shape
    bound = gain * (6.0 / (fan_in + fan_out)) ** 0.5
    return jax.random.uniform(key, shape, jnp.float32, -bound, bound)


# --------------------------------------------------------------------------- self-test
if __name__ == "__main__":

    def run_case(n_nodes, hidden, num_classes, num_graphs, use_tanh, tile_n,
                 with_graph=True, activation_dtype=None, tol=1e-4):
        keys = jax.random.split(jax.random.PRNGKey(0), 7)
        x_in = jax.random.normal(keys[0], (n_nodes, hidden), jnp.float32)
        x_out = jax.random.normal(keys[1], (n_nodes, hidden), jnp.float32)
        gate_w = _xavier_uniform(keys[2], (num_classes, 2 * hidden))
        trans_w = _xavier_uniform(keys[3], (num_classes, hidden))
        gate_b = 0.1 * jax.random.normal(keys[4], (num_classes,), jnp.float32)
        trans_b = 0.1 * jax.random.normal(keys[5], (num_classes,), jnp.float32)
        gids = (jax.random.randint(keys[6], (n_nodes,), 0, num_graphs, jnp.int32)
                if with_graph else None)

        nodewise, graph = readout_forward(
            x_in, x_out, gate_w, gate_b, trans_w, trans_b,
            graph_nodes_list=gids,
            num_graphs=num_graphs if with_graph else None,
            use_tanh_readout=use_tanh, tile_n=tile_n,
            activation_dtype=activation_dtype)
        nodewise = jax.block_until_ready(nodewise)
        if graph is not None:
            graph = jax.block_until_ready(graph)

        # Mirror any bf16 streaming in the reference so tolerances stay tight.
        if activation_dtype is not None:
            x_in_r = x_in.astype(activation_dtype).astype(jnp.float32)
            x_out_r = x_out.astype(activation_dtype).astype(jnp.float32)
        else:
            x_in_r, x_out_r = x_in, x_out
        ref_node, ref_graph = _reference(
            x_in_r, x_out_r, gate_w, gate_b, trans_w, trans_b,
            gids, num_graphs if with_graph else None, use_tanh)

        assert nodewise.shape == (n_nodes, num_classes), nodewise.shape
        assert jnp.allclose(nodewise, ref_node, atol=tol, rtol=tol), \
            f"nodewise mismatch (n={n_nodes}, h={hidden}, tanh={use_tanh})"
        if with_graph:
            assert graph.shape == (num_graphs, num_classes), graph.shape
            assert jnp.allclose(graph, ref_graph, atol=tol, rtol=tol), \
                f"graph readout mismatch (n={n_nodes}, h={hidden}, tanh={use_tanh})"
        else:
            assert graph is None

    # 1) small single-tile, narrow-C path, with and without tanh readout
    run_case(64, 32, 4, 3, use_tanh=False, tile_n=1024)
    run_case(64, 32, 4, 3, use_tanh=True, tile_n=1024)
    # 2) nodewise-only path (no graph labels -> "parallel" grid, single output)
    run_case(64, 32, 4, 3, use_tanh=False, tile_n=1024, with_graph=False)
    # 3) multi-tile grid + lane-padded C (128) + combined x_out matmul + -1 row padding
    run_case(200, 256, 4, 5, use_tanh=True, tile_n=128)
    # 4) bf16 activation streaming (bandwidth lever for v6e/v7x)
    run_case(64, 32, 4, 3, use_tanh=False, tile_n=1024,
             activation_dtype=jnp.bfloat16, tol=5e-3)

    print("KERNEL_OK")
</pallas_src>

<mosaic_0001>
module attributes {stable_mosaic.version = 11 : i64} {
  func.func @_readout_kernel(%arg0: i32, %arg1: memref<1x64xi32, #tpu.memory_space<vmem>>, %arg2: memref<64x32xf32, #tpu.memory_space<vmem>>, %arg3: memref<64x32xf32, #tpu.memory_space<vmem>>, %arg4: memref<32x4xf32, #tpu.memory_space<vmem>>, %arg5: memref<32x4xf32, #tpu.memory_space<vmem>>, %arg6: memref<32x4xf32, #tpu.memory_space<vmem>>, %arg7: memref<1x4xf32, #tpu.memory_space<vmem>>, %arg8: memref<1x4xf32, #tpu.memory_space<vmem>>, %arg9: memref<64x4xf32, #tpu.memory_space<vmem>>, %arg10: memref<3x4xf32, #tpu.memory_space<vmem>>) attributes {dimension_semantics = [#tpu.dimension_semantics<arbitrary>], iteration_bounds = array<i64: 1>, scalar_prefetch = 0 : i64, scratch_operands = 0 : i64, tpu.core_type = #tpu.core_type<tc>, window_params = [{transform_indices = @transform_0, window_bounds = array<i64: 1, 64>}, {transform_indices = @transform_1, window_bounds = array<i64: 64, 32>}, {transform_indices = @transform_2, window_bounds = array<i64: 64, 32>}, {pipeline_mode = #tpu.pipeline_mode<synchronous>, transform_indices = @transform_3, window_bounds = array<i64: 32, 4>}, {pipeline_mode = #tpu.pipeline_mode<synchronous>, transform_indices = @transform_4, window_bounds = array<i64: 32, 4>}, {pipeline_mode = #tpu.pipeline_mode<synchronous>, transform_indices = @transform_5, window_bounds = array<i64: 32, 4>}, {pipeline_mode = #tpu.pipeline_mode<synchronous>, transform_indices = @transform_6, window_bounds = array<i64: 1, 4>}, {pipeline_mode = #tpu.pipeline_mode<synchronous>, transform_indices = @transform_7, window_bounds = array<i64: 1, 4>}, {transform_indices = @transform_8, window_bounds = array<i64: 64, 4>}, {pipeline_mode = #tpu.pipeline_mode<synchronous>, transform_indices = @transform_9, window_bounds = array<i64: 3, 4>}]} {
    %c0 = arith.constant 0 : index
    %c0_0 = arith.constant 0 : index
    %0 = vector.load %arg2[%c0, %c0_0] : memref<64x32xf32, #tpu.memory_space<vmem>>, vector<64x32xf32>
    %c0_1 = arith.constant 0 : index
    %c0_2 = arith.constant 0 : index
    %1 = vector.load %arg3[%c0_1, %c0_2] : memref<64x32xf32, #tpu.memory_space<vmem>>, vector<64x32xf32>
    %c0_3 = arith.constant 0 : index
    %c0_4 = arith.constant 0 : index
    %2 = vector.load %arg4[%c0_3, %c0_4] : memref<32x4xf32, #tpu.memory_space<vmem>>, vector<32x4xf32>
    %cst = arith.constant dense<0.000000e+00> : vector<64x4xf32>
    %3 = tpu.matmul %0, %2, %cst {dimension_numbers = #tpu.dot_dimension_numbers<[1], [0], [0], [1], [0, 0, 1, 1], [], []>} : vector<64x32xf32>, vector<32x4xf32>, vector<64x4xf32> -> vector<64x4xf32>
    %c0_5 = arith.constant 0 : index
    %c0_6 = arith.constant 0 : index
    %4 = vector.load %arg5[%c0_5, %c0_6] : memref<32x4xf32, #tpu.memory_space<vmem>>, vector<32x4xf32>
    %cst_7 = arith.constant dense<0.000000e+00> : vector<64x4xf32>
    %5 = tpu.matmul %1, %4, %cst_7 {dimension_numbers = #tpu.dot_dimension_numbers<[1], [0], [0], [1], [0, 0, 1, 1], [], []>} : vector<64x32xf32>, vector<32x4xf32>, vector<64x4xf32> -> vector<64x4xf32>
    %6 = arith.addf %3, %5 : vector<64x4xf32>
    %c0_8 = arith.constant 0 : index
    %c0_9 = arith.constant 0 : index
    %7 = vector.load %arg7[%c0_8, %c0_9] : memref<1x4xf32, #tpu.memory_space<vmem>>, vector<1x4xf32>
    %8 = vector.broadcast %7 : vector<1x4xf32> to vector<64x4xf32>
    %9 = arith.addf %6, %8 : vector<64x4xf32>
    %c0_10 = arith.constant 0 : index
    %c0_11 = arith.constant 0 : index
    %10 = vector.load %arg6[%c0_10, %c0_11] : memref<32x4xf32, #tpu.memory_space<vmem>>, vector<32x4xf32>
    %cst_12 = arith.constant dense<0.000000e+00> : vector<64x4xf32>
    %11 = tpu.matmul %1, %10, %cst_12 {dimension_numbers = #tpu.dot_dimension_numbers<[1], [0], [0], [1], [0, 0, 1, 1], [], []>} : vector<64x32xf32>, vector<32x4xf32>, vector<64x4xf32> -> vector<64x4xf32>
    %c0_13 = arith.constant 0 : index
    %c0_14 = arith.constant 0 : index
    %12 = vector.load %arg8[%c0_13, %c0_14] : memref<1x4xf32, #tpu.memory_space<vmem>>, vector<1x4xf32>
    %13 = vector.broadcast %12 : vector<1x4xf32> to vector<64x4xf32>
    %14 = arith.addf %11, %13 : vector<64x4xf32>
    %15 = arith.negf %9 : vector<64x4xf32>
    %16 = math.exp %15 : vector<64x4xf32>
    %cst_15 = arith.constant 1.000000e+00 : f32
    %17 = vector.broadcast %cst_15 : f32 to vector<64x4xf32>
    %18 = arith.addf %17, %16 : vector<64x4xf32>
    %19 = arith.divf %17, %18 : vector<64x4xf32>
    %20 = arith.mulf %19, %14 : vector<64x4xf32>
    %c0_16 = arith.constant 0 : index
    %c0_17 = arith.constant 0 : index
    %21 = vector.load %arg9[%c0_16, %c0_17] : memref<64x4xf32, #tpu.memory_space<vmem>>, vector<64x4xf32>
    tpu.vector_store %arg9[%c0_16, %c0_17], %20 {strides = array<i32>} : memref<64x4xf32, #tpu.memory_space<vmem>>, vector<64x4xf32>,
    %c0_18 = arith.constant 0 : index
    %c0_19 = arith.constant 0 : index
    %22 = vector.load %arg1[%c0_18, %c0_19] : memref<1x64xi32, #tpu.memory_space<vmem>>, vector<1x64xi32>
    %c0_i32 = arith.constant 0 : i32
    %23 = arith.cmpi eq, %arg0, %c0_i32 : i32
    %24 = arith.extui %23 : i1 to i32
    %c0_i32_20 = arith.constant 0 : i32
    %25 = arith.cmpi ne, %24, %c0_i32_20 : i32
    scf.if %25 {
      %cst_26 = arith.constant 0.000000e+00 : f32
      %35 = vector.broadcast %cst_26 : f32 to vector<3x4xf32>
      %c0_27 = arith.constant 0 : index
      %c0_28 = arith.constant 0 : index
      %36 = vector.load %arg10[%c0_27, %c0_28] : memref<3x4xf32, #tpu.memory_space<vmem>>, vector<3x4xf32>
      tpu.vector_store %arg10[%c0_27, %c0_28], %35 {strides = array<i32>} : memref<3x4xf32, #tpu.memory_space<vmem>>, vector<3x4xf32>,
    } else {
    }
    %26 = tpu.iota {dimensions = array<i32: 0>} : vector<3x64xi32>
    %27 = vector.broadcast %22 : vector<1x64xi32> to vector<3x64xi32>
    %28 = arith.cmpi eq, %26, %27 : vector<3x64xi32>
    %29 = arith.extui %28 : vector<3x64xi1> to vector<3x64xi32>
    %30 = arith.sitofp %29 : vector<3x64xi32> to vector<3x64xf32>
    %c0_21 = arith.constant 0 : index
    %c0_22 = arith.constant 0 : index
    %31 = vector.load %arg10[%c0_21, %c0_22] : memref<3x4xf32, #tpu.memory_space<vmem>>, vector<3x4xf32>
    %cst_23 = arith.constant dense<0.000000e+00> : vector<3x4xf32>
    %32 = tpu.matmul %30, %20, %cst_23 {dimension_numbers = #tpu.dot_dimension_numbers<[1], [0], [0], [1], [0, 0, 1, 1], [], []>} : vector<3x64xf32>, vector<64x4xf32>, vector<3x4xf32> -> vector<3x4xf32>
    %33 = arith.addf %31, %32 : vector<3x4xf32>
    %c0_24 = arith.constant 0 : index
    %c0_25 = arith.constant 0 : index
    %34 = vector.load %arg10[%c0_24, %c0_25] : memref<3x4xf32, #tpu.memory_space<vmem>>, vector<3x4xf32>
    tpu.vector_store %arg10[%c0_24, %c0_25], %33 {strides = array<i32>} : memref<3x4xf32, #tpu.memory_space<vmem>>, vector<3x4xf32>,
    return
  }
  func.func @transform_0(%arg0: i32) -> (i32, i32) {
    %c0_i32 = arith.constant 0 : i32
    %c0_i32_0 = arith.constant 0 : i32
    return %c0_i32, %arg0 : i32, i32
  }
  func.func @transform_1(%arg0: i32) -> (i32, i32) {
    %c0_i32 = arith.constant 0 : i32
    %c0_i32_0 = arith.constant 0 : i32
    return %arg0, %c0_i32 : i32, i32
  }
  func.func @transform_2(%arg0: i32) -> (i32, i32) {
    %c0_i32 = arith.constant 0 : i32
    %c0_i32_0 = arith.constant 0 : i32
    return %arg0, %c0_i32 : i32, i32
  }
  func.func @transform_3(%arg0: i32) -> (i32, i32) {
    %c0_i32 = arith.constant 0 : i32
    %c0_i32_0 = arith.constant 0 : i32
    %c0_i32_1 = arith.constant 0 : i32
    return %c0_i32, %c0_i32_0 : i32, i32
  }
  func.func @transform_4(%arg0: i32) -> (i32, i32) {
    %c0_i32 = arith.constant 0 : i32
    %c0_i32_0 = arith.constant 0 : i32
    %c0_i32_1 = arith.constant 0 : i32
    return %c0_i32, %c0_i32_0 : i32, i32
  }
  func.func @transform_5(%arg0: i32) -> (i32, i32) {
    %c0_i32 = arith.constant 0 : i32
    %c0_i32_0 = arith.constant 0 : i32
    %c0_i32_1 = arith.constant 0 : i32
    return %c0_i32, %c0_i32_0 : i32, i32
  }
  func.func @transform_6(%arg0: i32) -> (i32, i32) {
    %c0_i32 = arith.constant 0 : i32
    %c0_i32_0 = arith.constant 0 : i32
    %c0_i32_1 = arith.constant 0 : i32
    return %c0_i32, %c0_i32_0 : i32, i32
  }
  func.func @transform_7(%arg0: i32) -> (i32, i32) {
    %c0_i32 = arith.constant 0 : i32
    %c0_i32_0 = arith.constant 0 : i32
    %c0_i32_1 = arith.constant 0 : i32
    return %c0_i32, %c0_i32_0 : i32, i32
  }
  func.func @transform_8(%arg0: i32) -> (i32, i32) {
    %c0_i32 = arith.constant 0 : i32
    %c0_i32_0 = arith.constant 0 : i32
    return %arg0, %c0_i32 : i32, i32
  }
  func.func @transform_9(%arg0: i32) -> (i32, i32) {
    %c0_i32 = arith.constant 0 : i32
    %c0_i32_0 = arith.constant 0 : i32
    %c0_i32_1 = arith.constant 0 : i32
    return %c0_i32, %c0_i32_0 : i32, i32
  }
}

</mosaic_0001>

<bundles_post_ra>
// kernel: tpu_custom_call.1
= control target key start
LH: loop header
LB: loop body
LE: loop exit
PB: predicated region body
PF: predicated region fallthrough
CT: control target
= control target key end

     0   :  { %vm56_vm0 = vcmask 261120   ;;  %s834_s0 = inlined_call_operand.vmem [shape: s32[1,64], index: 0, kind: input, shape index: {}]   ;;  %s835_s1 = inlined_call_operand.vmem [shape: f32[64,32], index: 1, kind: input, shape index: {}]   ;;  %s836_s2 = inlined_call_operand.vmem [shape: f32[64,32], index: 2, kind: input, shape index: {}]   ;;  %s837_s3 = inlined_call_operand.vmem [shape: f32[32,4], index: 3, kind: input, shape index: {}]   ;;  %s838_s4 = inlined_call_operand.vmem [shape: f32[32,4], index: 4, kind: input, shape index: {}]   ;;  %s839_s5 = inlined_call_operand.vmem [shape: f32[32,4], index: 5, kind: input, shape index: {}]   ;;  %s840_s6 = inlined_call_operand.vmem [shape: f32[1,4], index: 6, kind: input, shape index: {}]   ;;  %s841_s7 = inlined_call_operand.vmem [shape: f32[1,4], index: 7, kind: input, shape index: {}]   ;;  %s842_s8 = inlined_call_operand.vmem [shape: f32[64,4], index: 8, kind: output, shape index: {0}]   ;;  %s843_s9 = inlined_call_operand.hbm [shape: f32[3,4], index: 9, kind: output, shape index: {1}]  }
   0x1   :  { %v55_v0 = vld [vmem:[%s838_s4 + $0x18] sm:$0xff]  ;;  %v54_v2 = vld [vmem:[%s838_s4 + $0x10] sm:$0xff]  ;;  %v53_v4 = vld [vmem:[%s838_s4 + $0x8] sm:$0xff] }
   0x2   :  { %v51_v1 = vld [vmem:[%s837_s3 + $0x18] sm:$0xff]  ;;  %93 = vmatpush.msra.mxu0 %v55_v0  ;;  %v50_v3 = vld [vmem:[%s837_s3 + $0x10] sm:$0xff]  ;;  %v49_v5 = vld [vmem:[%s837_s3 + $0x8] sm:$0xff] }
   0x3   :  { %158 = vmatpush.msra.mxu1 %v51_v1  ;;  %v52_v6 = vld [vmem:[%s838_s4] sm:$0xff]  ;;  %v202_v8 = vld [vmem:[%s839_s5 + $0x18] sm:$0xff]  ;;  %v201_v11 = vld [vmem:[%s839_s5 + $0x10] sm:$0xff] }
   0x4   :  { %94 = vmatpush.msra.mxu0 %v54_v2  ;;  %v48_v7 = vld [vmem:[%s837_s3] sm:$0xff]  ;;  %219 = vmatpush.msra.mxu2 %v202_v8  ;;  %v200_v12 = vld [vmem:[%s839_s5 + $0x8] sm:$0xff] }
   0x5   :  { %159 = vmatpush.msra.mxu1 %v50_v3  ;;  %v40_v9 = vld [vmem:[%s836_s2] sm:$0xff] }
   0x6   :  { %95 = vmatpush.msra.mxu0 %v53_v4  ;;  %v32_v10 = vld [vmem:[%s835_s1] sm:$0xff] }
   0x7   :  { %160 = vmatpush.msra.mxu1 %v49_v5 }
   0x8   :  { %96 = vmatpush.msra.mxu0 %v52_v6 }
   0x9   :  { %161 = vmatpush.msra.mxu1 %v48_v7  ;;  %478 = vmatmul.msk.f32.vlgmr.msra.gmra.mxu0 %vm56_vm0, %v40_v9 }
   0xa   :  { %486 = vmatmul.msk.f32.vlgmr.msra.gmra.mxu1 %vm56_vm0, %v32_v10 }
   0xb   :  { %15 = vsyncpa [#allocation3], 0  ;;  %220 = vmatpush.msra.mxu2 %v201_v11  ;;  %v199_v13 = vld [vmem:[%s839_s5] sm:$0xff]  ;;  %v41_v14 = vld [vmem:[%s836_s2 + $0x8] sm:$0xff]  ;;  %vm408_vm5 = vcmask 31744   ;;  %s467_s14 = sshll.u32 %s843_s9, 4  ;;  %s468_s14 = int_to_ptr.hbm [resolvable:$true] %s467_s14 }
   0xc   :  { %v33_v15 = vld [vmem:[%s835_s1 + $0x8] sm:$0xff]  ;;  %v42_v16 = vld [vmem:[%s836_s2 + $0x10] sm:$0xff]  ;;  %v43_v18 = vld [vmem:[%s836_s2 + $0x18] sm:$0xff] }
   0xd   :  { %221 = vmatpush.msra.mxu2 %v200_v12  ;;  %v34_v17 = vld [vmem:[%s835_s1 + $0x10] sm:$0xff]  ;;  %v35_v19 = vld [vmem:[%s835_s1 + $0x18] sm:$0xff]  ;;  %v44_v20 = vld [vmem:[%s836_s2 + $0x20] sm:$0xff] }
   0xe   :  { %v36_v21 = vld [vmem:[%s835_s1 + $0x20] sm:$0xff]  ;;  %v45_v22 = vld [vmem:[%s836_s2 + $0x28] sm:$0xff]  ;;  %v46_v24 = vld [vmem:[%s836_s2 + $0x30] sm:$0xff] }
   0xf   :  { %222 = vmatpush.msra.mxu2 %v199_v13  ;;  %v37_v23 = vld [vmem:[%s835_s1 + $0x28] sm:$0xff]  ;;  %v38_v25 = vld [vmem:[%s835_s1 + $0x30] sm:$0xff]  ;;  %v47_v26 = vld [vmem:[%s836_s2 + $0x38] sm:$0xff] }
  0x10   :  { %494 = vmatmul.msk.f32.vlgmr.msra.gmra.mxu2 %vm56_vm0, %v40_v9  ;;  %v39_v27 = vld [vmem:[%s835_s1 + $0x38] sm:$0xff]  ;;  %v737_v28 = vld [vmem:[%s840_s6] ss:$0 sm:$0xff] }
  0x11   :  { %479 = vmatmul.msk.f32.gmra.mxu0 %vm56_vm0, %v41_v14  ;;  %v745_v56 = vld [vmem:[%s841_s7] ss:$0 sm:$0xff] }
  0x12   :  { %487 = vmatmul.msk.f32.gmra.mxu1 %vm56_vm0, %v33_v15 }
  0x18   :  { %495 = vmatmul.msk.f32.gmra.mxu2 %vm56_vm0, %v41_v14 }
  0x19   :  { %480 = vmatmul.msk.f32.gmra.mxu0 %vm56_vm0, %v42_v16 }
  0x1a   :  { %488 = vmatmul.msk.f32.gmra.mxu1 %vm56_vm0, %v34_v17 }
  0x20   :  { %496 = vmatmul.msk.f32.gmra.mxu2 %vm56_vm0, %v42_v16 }
  0x21   :  { %481 = vmatmul.msk.f32.gmra.mxu0 %vm56_vm0, %v43_v18 }
  0x22   :  { %489 = vmatmul.msk.f32.gmra.mxu1 %vm56_vm0, %v35_v19 }
  0x28   :  { %497 = vmatmul.msk.f32.gmra.mxu2 %vm56_vm0, %v43_v18 }
  0x29   :  { %482 = vmatmul.msk.f32.gmra.mxu0 %vm56_vm0, %v44_v20 }
  0x2a   :  { %490 = vmatmul.msk.f32.gmra.mxu1 %vm56_vm0, %v36_v21 }
  0x30   :  { %498 = vmatmul.msk.f32.gmra.mxu2 %vm56_vm0, %v44_v20 }
  0x31   :  { %483 = vmatmul.msk.f32.gmra.mxu0 %vm56_vm0, %v45_v22 }
  0x32   :  { %491 = vmatmul.msk.f32.gmra.mxu1 %vm56_vm0, %v37_v23 }
  0x38   :  { %499 = vmatmul.msk.f32.gmra.mxu2 %vm56_vm0, %v45_v22 }
  0x39   :  { %484 = vmatmul.msk.f32.gmra.mxu0 %vm56_vm0, %v46_v24 }
  0x3a   :  { %492 = vmatmul.msk.f32.gmra.mxu1 %vm56_vm0, %v38_v25 }
  0x40   :  { %500 = vmatmul.msk.f32.gmra.mxu2 %vm56_vm0, %v46_v24 }
  0x41   :  { %485 = vmatmul.msk.f32.gmra.mxu0 %vm56_vm0, %v47_v26 }
  0x42   :  { %493 = vmatmul.msk.f32.gmra.mxu1 %vm56_vm0, %v39_v27 }
  0x48   :  { %501 = vmatmul.msk.f32.gmra.mxu2 %vm56_vm0, %v47_v26 }
  0x86   :  { %v98_v29 = vpop.f32.mrf.mxu0 }
  0x87   :  { %v163_v30 = vpop.f32.mrf.mxu1 }
  0x88   :  { %v164_v31 = vadd.f32 %v163_v30, %v98_v29 }
  0x8a   :  { %v191_v32 = vadd.f32 %v737_v28, %v164_v31 }
  0x8c   :  { %v502_v33 = vmul.f32 -1.442695, %v191_v32 }
  0x8e   :  { %516 = vpow2.f32 %v502_v33  ;;  %v101_v34 = vpop.f32.mrf.mxu0 }
  0x8f   :  { %v166_v35 = vpop.f32.mrf.mxu1 }
  0x90   :  { %v167_v36 = vadd.f32 %v166_v35, %v101_v34 }
  0x92   :  { %v192_v37 = vadd.f32 %v737_v28, %v167_v36 }
  0x93   :  { %v224_v38 = vpop.f32.mrf.mxu2 }
  0x94   :  { %v517_v39 = vpop.eup %516  ;;  %v503_v40 = vmul.f32 -1.442695, %v192_v37  ;;  %v225_v2 = vadd.f32 %v745_v56, %v224_v38 }
  0x95   :  { %v272_v41 = vadd.f32 1.0, %v517_v39 }
  0x96   :  { %518 = vpow2.f32 %v503_v40  ;;  %v104_v42 = vpop.f32.mrf.mxu0 }
  0x97   :  { %520 = vrcp.f32 %v272_v41  ;;  %v169_v43 = vpop.f32.mrf.mxu1  ;;  %v291_v59 = vand.u32 2147483648, %v272_v41  ;;  %v289_v60 = vand.u32 2147483647, %v272_v41  ;;  %vm285_vm2 = vweird.f32 %v272_v41 }
  0x98   :  { %v170_v44 = vadd.f32 %v169_v43, %v104_v42 }
  0x99   :  { %v292_v6 = vor.u32 1.1754944e-38, %v291_v59  ;;  %vm290_vm4 = vcmp.eq.f32.partialorder %v289_v60, 8.507059e+37 }
  0x9a   :  { %v193_v45 = vadd.f32 %v737_v28, %v170_v44 }
  0x9b   :  { %v227_v48 = vpop.f32.mrf.mxu2 }
  0x9c   :  { %v519_v46 = vpop.eup %518  ;;  %v504_v47 = vmul.f32 -1.442695, %v193_v45  ;;  %v228_v22 = vadd.f32 %v745_v56, %v227_v48 }
  0x9d   :  { %v521_v49 = vpop.eup %520  ;;  %v273_v50 = vadd.f32 1.0, %v519_v46 }
  0x9e   :  { %522 = vpow2.f32 %v504_v47  ;;  %v281_v51 = vmul.f32 %v521_v49, %v272_v41  ;;  %v107_v52 = vpop.f32.mrf.mxu0  ;;  %vm286_vm1 = vweird.f32 %v521_v49 }
  0x9f   :  { %524 = vrcp.f32 %v273_v50  ;;  %v172_v53 = vpop.f32.mrf.mxu1  ;;  %vm287_vm3 = vmor %vm285_vm2, %vm286_vm1  ;;  %v306_v15 = vand.u32 2147483648, %v273_v50  ;;  %v304_v16 = vand.u32 2147483647, %v273_v50  ;;  %vm300_vm7 = vweird.f32 %v273_v50 }
  0xa0   :  { %v173_v54 = vadd.f32 %v172_v53, %v107_v52  ;;  %v282_v55 = vsub.f32 1.0, %v281_v51 }
  0xa1   :  { %v307_v25 = vor.u32 1.1754944e-38, %v306_v15  ;;  %vm305_vm9 = vcmp.eq.f32.partialorder %v304_v16, 8.507059e+37 }
  0xa2   :  { %v194_v57 = vadd.f32 %v737_v28, %v173_v54  ;;  %v283_v58 = vmul.f32 %v521_v49, %v282_v55 }
  0xa3   :  { %v230_v3 = vpop.f32.mrf.mxu2 }
  0xa4   :  { %v523_v61 = vpop.eup %522  ;;  %v505_v62 = vmul.f32 -1.442695, %v194_v57  ;;  %v284_v63 = vadd.f32 %v521_v49, %v283_v58  ;;  %v231_v43 = vadd.f32 %v745_v56, %v230_v3 }
  0xa5   :  { %v525_v0 = vpop.eup %524  ;;  %v748_v1 = vadd.f32 1.0, %v523_v61 }
  0xa6   :  { %526 = vpow2.f32 %v505_v62  ;;  %v296_v4 = vmul.f32 %v525_v0, %v273_v50  ;;  %v288_v5 = vsel %vm287_vm3, %v521_v49, %v284_v63  ;;  %v110_v7 = vpop.f32.mrf.mxu0  ;;  %vm301_vm6 = vweird.f32 %v525_v0 }
  0xa7   :  { %528 = vrcp.f32 %v748_v1  ;;  %v175_v8 = vpop.f32.mrf.mxu1  ;;  %v293_v11 = vsel %vm290_vm4, %v292_v6, %v288_v5  ;;  %vm302_vm8 = vmor %vm300_vm7, %vm301_vm6  ;;  %v321_v36 = vand.u32 2147483648, %v748_v1  ;;  %v319_v37 = vand.u32 2147483647, %v748_v1 }
  0xa8   :  { %v176_v9 = vadd.f32 %v175_v8, %v110_v7  ;;  %v297_v10 = vsub.f32 1.0, %v296_v4  ;;  %v752_v12 = vmul.f32 %v293_v11, %v225_v2  ;;  %vm315_vm11 = vweird.f32 %v748_v1 }
  0xa9   :  { %v322_v46 = vor.u32 1.1754944e-38, %v321_v36  ;;  %vm320_vm13 = vcmp.eq.f32.partialorder %v319_v37, 8.507059e+37 }
  0xaa   :  { %v195_v13 = vadd.f32 %v737_v28, %v176_v9  ;;  %v298_v14 = vmul.f32 %v525_v0, %v297_v10  ;;  %409 = vst.msk [vmem:[%s842_s8] sm:$0xff] %vm408_vm5, %v752_v12 }
  0xab   :  { %v233_v32 = vpop.f32.mrf.mxu2 }
  0xac   :  { %v527_v17 = vpop.eup %526  ;;  %v506_v18 = vmul.f32 -1.442695, %v195_v13  ;;  %v299_v19 = vadd.f32 %v525_v0, %v298_v14 }
  0xad   :  { %v529_v20 = vpop.eup %528  ;;  %v760_v21 = vadd.f32 1.0, %v527_v17 }
  0xae   :  { %530 = vpow2.f32 %v506_v18  ;;  %v311_v23 = vmul.f32 %v529_v20, %v748_v1  ;;  %v303_v24 = vsel %vm302_vm8, %v525_v0, %v299_v19  ;;  %v113_v26 = vpop.f32.mrf.mxu0  ;;  %vm316_vm10 = vweird.f32 %v529_v20 }
  0xaf   :  { %532 = vrcp.f32 %v760_v21  ;;  %v178_v27 = vpop.f32.mrf.mxu1  ;;  %v308_v31 = vsel %vm305_vm9, %v307_v25, %v303_v24  ;;  %vm317_vm12 = vmor %vm315_vm11, %vm316_vm10  ;;  %v336_v55 = vand.u32 2147483648, %v760_v21  ;;  %v334_v58 = vand.u32 2147483647, %v760_v21 }
  0xb0   :  { %v179_v29 = vadd.f32 %v178_v27, %v113_v26  ;;  %v312_v30 = vsub.f32 1.0, %v311_v23  ;;  %v765_v33 = vmul.f32 %v308_v31, %v228_v22  ;;  %vm330_vm15 = vweird.f32 %v760_v21 }
  0xb1   :  { %v234_v0 = vadd.f32 %v745_v56, %v233_v32  ;;  %v337_v3 = vor.u32 1.1754944e-38, %v336_v55  ;;  %vm335_vm1 = vcmp.eq.f32.partialorder %v334_v58, 8.507059e+37  ;;  %vm422_vm11 = vcmask 26624  }
  0xb2   :  { %v196_v34 = vadd.f32 %v737_v28, %v179_v29  ;;  %v313_v35 = vmul.f32 %v529_v20, %v312_v30  ;;  %410 = vst.msk [vmem:[%s842_s8 + $0x8] sm:$0xff] %vm408_vm5, %v765_v33 }
  0xb3   :  { %v236_v57 = vpop.f32.mrf.mxu2 }
  0xb4   :  { %v531_v38 = vpop.eup %530  ;;  %v507_v39 = vmul.f32 -1.442695, %v196_v34  ;;  %v314_v40 = vadd.f32 %v529_v20, %v313_v35 }
  0xb5   :  { %v533_v41 = vpop.eup %532  ;;  %v276_v42 = vadd.f32 1.0, %v531_v38 }
  0xb6   :  { %534 = vpow2.f32 %v507_v39  ;;  %v326_v44 = vmul.f32 %v533_v41, %v760_v21  ;;  %v318_v45 = vsel %vm317_vm12, %v529_v20, %v314_v40  ;;  %v116_v47 = vpop.f32.mrf.mxu0  ;;  %vm331_vm14 = vweird.f32 %v533_v41 }
  0xb7   :  { %536 = vrcp.f32 %v276_v42  ;;  %v181_v48 = vpop.f32.mrf.mxu1  ;;  %v323_v51 = vsel %vm320_vm13, %v322_v46, %v318_v45  ;;  %vm332_vm0 = vmor %vm330_vm15, %vm331_vm14  ;;  %v351_v13 = vand.u32 2147483648, %v276_v42  ;;  %v349_v14 = vand.u32 2147483647, %v276_v42 }
  0xb8   :  { %v182_v49 = vadd.f32 %v181_v48, %v116_v47  ;;  %v327_v50 = vsub.f32 1.0, %v326_v44  ;;  %v778_v52 = vmul.f32 %v323_v51, %v231_v43  ;;  %vm345_vm3 = vweird.f32 %v276_v42 }
  0xb9   :  { %v237_v20 = vadd.f32 %v745_v56, %v236_v57  ;;  %v352_v23 = vor.u32 1.1754944e-38, %v351_v13  ;;  %vm350_vm6 = vcmp.eq.f32.partialorder %v349_v14, 8.507059e+37  ;;  %v574_v45 = vmov 0.0  }
  0xba   :  { %v197_v53 = vadd.f32 %v737_v28, %v182_v49  ;;  %v328_v54 = vmul.f32 %v533_v41, %v327_v50  ;;  %411 = vst.msk [vmem:[%s842_s8 + $0x10] sm:$0xff] %vm408_vm5, %v778_v52 }
  0xbb   :  { %v239_v21 = vpop.f32.mrf.mxu2  ;;  %423 = vst.msk [vmem:[#allocation2] sm:$0x7] %vm422_vm11, %v574_v45 }
  0xbc   :  { %v535_v59 = vpop.eup %534  ;;  %v508_v60 = vmul.f32 -1.442695, %v197_v53  ;;  %v329_v61 = vadd.f32 %v533_v41, %v328_v54  ;;  %v240_v36 = vadd.f32 %v745_v56, %v239_v21 }
  0xbd   :  { %v537_v62 = vpop.eup %536  ;;  %v277_v63 = vadd.f32 1.0, %v535_v59 }
  0xbe   :  { %538 = vpow2.f32 %v508_v60  ;;  %v341_v1 = vmul.f32 %v537_v62, %v276_v42  ;;  %v333_v2 = vsel %vm332_vm0, %v533_v41, %v329_v61  ;;  %v119_v4 = vpop.f32.mrf.mxu0  ;;  %vm346_vm2 = vweird.f32 %v537_v62 }
  0xbf   :  { %540 = vrcp.f32 %v277_v63  ;;  %v184_v5 = vpop.f32.mrf.mxu1  ;;  %v338_v8 = vsel %vm335_vm1, %v337_v3, %v333_v2  ;;  %vm347_vm4 = vmor %vm345_vm3, %vm346_vm2  ;;  %v366_v29 = vand.u32 2147483648, %v277_v63  ;;  %v364_v30 = vand.u32 2147483647, %v277_v63 }
  0xc0   :  { %v185_v6 = vadd.f32 %v184_v5, %v119_v4  ;;  %v342_v7 = vsub.f32 1.0, %v341_v1  ;;  %v790_v9 = vmul.f32 %v338_v8, %v234_v0  ;;  %vm360_vm8 = vweird.f32 %v277_v63 }
  0xc1   :  { %v367_v39 = vor.u32 1.1754944e-38, %v366_v29  ;;  %vm365_vm10 = vcmp.eq.f32.partialorder %v364_v30, 8.507059e+37  ;;  %v424_v5 = vlaneseq }
  0xc2   :  { %v198_v10 = vadd.f32 %v737_v28, %v185_v6  ;;  %v343_v11 = vmul.f32 %v537_v62, %v342_v7  ;;  %412 = vst.msk [vmem:[%s842_s8 + $0x18] sm:$0xff] %vm408_vm5, %v790_v9 }
  0xc3   :  { %v242_v40 = vpop.f32.mrf.mxu2  ;;  %v425_v6 = vshrl.u32 %v424_v5, 7 }
  0xc4   :  { %v539_v15 = vpop.eup %538  ;;  %v509_v16 = vmul.f32 -1.442695, %v198_v10  ;;  %v344_v17 = vadd.f32 %v537_v62, %v343_v11  ;;  %v243_v48 = vadd.f32 %v745_v56, %v242_v40  ;;  %v430_v10 = vld [vmem:[#allocation2] sm:$0x7] }
  0xc5   :  { %v541_v18 = vpop.eup %540  ;;  %v278_v19 = vadd.f32 1.0, %v539_v15 }
  0xc6   :  { %542 = vpow2.f32 %v509_v16  ;;  %v356_v28 = vmul.f32 %v541_v18, %v277_v63  ;;  %v348_v22 = vsel %vm347_vm4, %v537_v62, %v344_v17  ;;  %vm361_vm7 = vweird.f32 %v541_v18 }
  0xc7   :  { %544 = vrcp.f32 %v278_v19  ;;  %v353_v25 = vsel %vm350_vm6, %v352_v23, %v348_v22  ;;  %vm362_vm9 = vmor %vm360_vm8, %vm361_vm7  ;;  %v381_v43 = vand.u32 2147483648, %v278_v19  ;;  %v379_v47 = vand.u32 2147483647, %v278_v19 }
  0xc8   :  { %v357_v24 = vsub.f32 1.0, %v356_v28  ;;  %v799_v26 = vmul.f32 %v353_v25, %v237_v20  ;;  %vm375_vm13 = vweird.f32 %v278_v19 }
  0xc9   :  { %v382_v51 = vor.u32 1.1754944e-38, %v381_v43  ;;  %vm380_vm15 = vcmp.eq.f32.partialorder %v379_v47, 8.507059e+37 }
  0xca   :  { %v358_v27 = vmul.f32 %v541_v18, %v357_v24  ;;  %413 = vst.msk [vmem:[%s842_s8 + $0x20] sm:$0xff] %vm408_vm5, %v799_v26 }
  0xcb   :  { %v245_v59 = vpop.f32.mrf.mxu2 }
  0xcc   :  { %v543_v31 = vpop.eup %542  ;;  %v359_v32 = vadd.f32 %v541_v18, %v358_v27  ;;  %v246_v63 = vadd.f32 %v745_v56, %v245_v59  ;;  %v417_v56 = vld [vmem:[%s834_s0] sm:$0x1] }
  0xcd   :  { %v545_v34 = vpop.eup %544  ;;  %v279_v35 = vadd.f32 1.0, %v543_v31  ;;  %v426_v7 = vperm.slane %v417_v56, 0 }
  0xce   :  { %v371_v37 = vmul.f32 %v545_v34, %v278_v19  ;;  %v363_v38 = vsel %vm362_vm9, %v541_v18, %v359_v32  ;;  %vm376_vm12 = vweird.f32 %v545_v34 }
  0xcf   :  { %546 = vrcp.f32 %v279_v35  ;;  %v368_v42 = vsel %vm365_vm10, %v367_v39, %v363_v38  ;;  %vm377_vm14 = vmor %vm375_vm13, %vm376_vm12  ;;  %v396_v60 = vand.u32 2147483648, %v279_v35  ;;  %v394_v62 = vand.u32 2147483647, %v279_v35 }
  0xd0   :  { %v372_v41 = vsub.f32 1.0, %v371_v37  ;;  %v405_v44 = vmul.f32 %v368_v42, %v240_v36  ;;  %vm390_vm1 = vweird.f32 %v279_v35  ;;  %vm427_vm4 = vcmp.eq.s32.totalorder %v425_v6, %v426_v7 }
  0xd1   :  { %v397_v1 = vor.u32 1.1754944e-38, %v396_v60  ;;  %vm395_vm3 = vcmp.eq.f32.partialorder %v394_v62, 8.507059e+37  ;;  %v510_v8 = vsel %vm427_vm4, 1.0, %v574_v45 }
  0xd2   :  { %v373_v46 = vmul.f32 %v545_v34, %v372_v41  ;;  %414 = vst.msk [vmem:[%s842_s8 + $0x28] sm:$0xff] %vm408_vm5, %v405_v44 }
  0xd4   :  { %v374_v49 = vadd.f32 %v545_v34, %v373_v46 }
  0xd5   :  { %v547_v50 = vpop.eup %546 }
  0xd6   :  { %v386_v53 = vmul.f32 %v547_v50, %v279_v35  ;;  %v378_v54 = vsel %vm377_vm14, %v545_v34, %v374_v49  ;;  %vm391_vm0 = vweird.f32 %v547_v50 }
  0xd7   :  { %v383_v55 = vsel %vm380_vm15, %v382_v51, %v378_v54  ;;  %vm392_vm2 = vmor %vm390_vm1, %vm391_vm0 }
  0xd8   :  { %v387_v57 = vsub.f32 1.0, %v386_v53  ;;  %v406_v58 = vmul.f32 %v383_v55, %v243_v48 }
  0xda   :  { %v388_v61 = vmul.f32 %v547_v50, %v387_v57  ;;  %415 = vst.msk [vmem:[%s842_s8 + $0x30] sm:$0xff] %vm408_vm5, %v406_v58 }
  0xdc   :  { %v389_v0 = vadd.f32 %v547_v50, %v388_v61 }
  0xde   :  { %v393_v2 = vsel %vm392_vm2, %v547_v50, %v389_v0 }
  0xdf   :  { %v398_v3 = vsel %vm395_vm3, %v397_v1, %v393_v2 }
  0xe0   :  { %v407_v4 = vmul.f32 %v398_v3, %v246_v63 }
  0xe2   :  { %416 = vst.msk [vmem:[%s842_s8 + $0x38] sm:$0xff] %vm408_vm5, %v407_v4  ;;  %443 = vmatpush.msra.mxu3 %v407_v4  ;;  %vm431_vm5 = vcmask 523264   ;;  %s575_s8 = smov [#allocation2]  }
  0xe3   :  { %s465_s0 = sshll.u32 %s575_s8, 4  ;;  %s466_s0 = int_to_ptr.vmem [resolvable:$true] %s465_s0 }
  0xe4   :  { %444 = vmatpush.msra.mxu3 %v406_v58 }
  0xe6   :  { %445 = vmatpush.msra.mxu3 %v405_v44 }
  0xe8   :  { %446 = vmatpush.msra.mxu3 %v799_v26 }
  0xea   :  { %447 = vmatpush.msra.mxu3 %v790_v9 }
  0xec   :  { %448 = vmatpush.msra.mxu3 %v778_v52 }
  0xee   :  { %449 = vmatpush.msra.mxu3 %v765_v33 }
  0xf0   :  { %450 = vmatpush.msra.mxu3 %v752_v12 }
  0xf1   :  { %511 = vmatmul.msk.f32.vlgmr.msra.gmra.mxu3 %vm431_vm5, %v510_v8 }
 0x174   :  { %v452_v11 = vpop.f32.mrf.mxu3 }
 0x175   :  { %v455_v13 = vadd.f32 %v452_v11, %v430_v10 }
 0x177   :  { %457 = vst.msk [vmem:[#allocation2] sm:$0x7] %vm422_vm11, %v455_v13 }
 0x178   :  { %470 = dma.vmem_to_hbm [thread:$0]  %s466_s0, 64, %s468_s14, [#allocation3]  }
 0x179   :  { %572 = dma.done.wait [#allocation3], 64  }
 0x17a   :  { %573 = vsyncadd [#allocation3], 4294967232 }
 0x17b   :  { %477 = vsyncpa [#allocation3], 1 }

</bundles_post_ra>
